<compile_context>
chip_gen: v7x
topology: tpu7x:2x2x1
jax: 0.10.0
libtpu: 0.0.40
codegen_flags: <defaults>
</compile_context>

<pallas_src>
import functools
import math

import jax
import jax.numpy as jnp
from jax import lax
from jax.experimental import pallas as pl
from jax.experimental.pallas import tpu as pltpu

# Python floats (NOT jnp arrays) so they lower as jaxpr literals, never as
# captured constants inside the Pallas kernel.
NEG_INF = -1e30
BIG_IDX = 1e9


def _round_up(x, m):
    return (x + m - 1) // m * m


def _pick_tile(dim, candidates):
    for c in candidates:
        if dim % c == 0:
            return c
    return dim


def _pick_batch_tile(b_pad):
    # Prefer >= 2 batch tiles (keeps both v7x TensorCores busy on the
    # "parallel" grid axis) while staying MXU-friendly (>= 128 rows).
    for c in (512, 256, 128):
        if b_pad % c == 0 and b_pad // c >= 2:
            return c
    for c in (512, 256, 128):
        if b_pad % c == 0:
            return c
    return b_pad


def _vmem_bytes(tm, tn, tk, logits_bytes, compute_stats):
    est = 0
    est += 2 * tm * tk * 2              # x (bf16, double-buffered)
    est += 2 * tk * tn * 2              # Wt (bf16, double-buffered)
    est += 2 * 1 * tn * 4               # bias (f32)
    est += 2 * tm * tn * logits_bytes   # logits output
    est += tm * tn * 4                  # f32 matmul accumulator scratch
    if compute_stats:
        est += 2 * tm * 4               # labels
        est += 2 * 8 * 128 * 4          # stats slab output
        est += 5 * tm * 4               # per-row CE scratch
    return est


# ---------------------------------------------------------------------------
# Fused kernel: logits = x @ Wt + b  (MXU, bf16 in / f32 acc)
#               + (optionally) online logsumexp / target-logit / argmax
# grid = (batch tiles i, class tiles j, feature tiles k); k innermost.
# ---------------------------------------------------------------------------
def _fused_kernel(*refs, n_classes, n_rows, tm, tn, mask_cols, compute_stats):
    if compute_stats:
        (x_ref, wt_ref, b_ref, lab_ref,
         logits_ref, stats_ref,
         acc_ref, m_ref, l_ref, t_ref, bv_ref, bi_ref) = refs
    else:
        (x_ref, wt_ref, b_ref, logits_ref, acc_ref) = refs

    i = pl.program_id(0)
    j = pl.program_id(1)
    k = pl.program_id(2)
    nj = pl.num_programs(1)
    nk = pl.num_programs(2)

    # ---- init: fold the bias into the accumulator (bias index_map is
    # k-invariant, so the k==0 bias block equals the k==nk-1 one).
    @pl.when(k == 0)
    def _():
        acc_ref[...] = jnp.broadcast_to(b_ref[...], (tm, tn))

    if compute_stats:
        @pl.when((j == 0) & (k == 0))
        def _():
            m_ref[...] = jnp.full_like(m_ref, NEG_INF)    # running max
            l_ref[...] = jnp.zeros_like(l_ref)            # running sum(exp)
            t_ref[...] = jnp.zeros_like(t_ref)            # target logit
            bv_ref[...] = jnp.full_like(bv_ref, NEG_INF)  # running best value
            bi_ref[...] = jnp.zeros_like(bi_ref)          # running best index

    # ---- MXU: bf16 operands, f32 accumulate
    acc_ref[...] += jnp.dot(x_ref[...], wt_ref[...],
                            preferred_element_type=jnp.float32)

    # ---- last feature tile: emit logits tile (+ online softmax/argmax update)
    @pl.when(k == nk - 1)
    def _():
        logits = acc_ref[...]                              # (tm, tn) f32, bias included
        logits_ref[...] = logits.astype(logits_ref.dtype)

        if compute_stats:
            col = j * tn + lax.broadcasted_iota(jnp.int32, (1, tn), 1)  # (1, tn)
            if mask_cols:
                masked = jnp.where(col < n_classes, logits, NEG_INF)
            else:
                masked = logits

            # online logsumexp
            tile_max = jnp.max(masked, axis=-1, keepdims=True)          # (tm, 1)
            m_prev = m_ref[...]
            m_new = jnp.maximum(m_prev, tile_max)
            alpha = jnp.exp(m_prev - m_new)
            p = jnp.exp(masked - m_new)
            l_ref[...] = alpha * l_ref[...] + jnp.sum(p, axis=-1, keepdims=True)
            m_ref[...] = m_new

            # target logit (select, no dynamic gather on vregs)
            lbl = lab_ref[...]                                          # (tm, 1) int32
            t_ref[...] += jnp.sum(jnp.where(col == lbl, logits, 0.0),
                                  axis=-1, keepdims=True)

            # running top-1 (argmax); smallest index wins ties.
            # f32 lane min-reduce on the column index (exact for n_classes < 2^24).
            cand = jnp.where(masked >= tile_max, col.astype(jnp.float32), BIG_IDX)
            tile_arg = jnp.min(cand, axis=-1, keepdims=True).astype(jnp.int32)
            better = tile_max > bv_ref[...]
            bv_ref[...] = jnp.where(better, tile_max, bv_ref[...])
            bi_ref[...] = jnp.where(better, tile_arg, bi_ref[...])

    # ---- finalize batch tile: per-tile loss sum + top-1 count (lane-dense slab)
    if compute_stats:
        @pl.when((k == nk - 1) & (j == nj - 1))
        def _():
            lse = m_ref[...] + jnp.log(l_ref[...])                      # (tm, 1)
            per_ex = lse - t_ref[...]
            row = i * tm + lax.broadcasted_iota(jnp.int32, (tm, 1), 0)
            valid = row < n_rows                                        # mask padded rows
            loss_sum = jnp.sum(jnp.where(valid, per_ex, 0.0))
            correct1 = jnp.sum(jnp.where(valid & (bi_ref[...] == lab_ref[...]),
                                         1.0, 0.0))

            r = lax.broadcasted_iota(jnp.int32, (8, 128), 0)
            c = lax.broadcasted_iota(jnp.int32, (8, 128), 1)
            stats_ref[...] = jnp.where(
                (r == 0) & (c == 0), loss_sum,
                jnp.where((r == 0) & (c == 1), correct1, 0.0))


def fused_linear_softmax(x_bf16, wt_bf16, bias_row, labels, *,
                         n_classes, n_rows, compute_stats):
    """x: (B_pad, F_pad) bf16; wt: (F_pad, C_pad) bf16; bias_row: (1, C_pad) f32;
    labels: (B_pad, 1) int32 or None.
    Returns logits_pad (f32) when compute_stats=False,
    else (logits_pad bf16, stats slab f32)."""
    B_pad, F_pad = x_bf16.shape
    C_pad = wt_bf16.shape[1]

    tm = _pick_batch_tile(B_pad)
    tn = _pick_tile(C_pad, (1024, 512, 256, 128))   # lane-dense class tile
    tk = _pick_tile(F_pad, (1024, 512, 256, 128))   # feature reduction tile
    grid = (B_pad // tm, C_pad // tn, F_pad // tk)

    # bf16 logits on the loss path (only needed for top-5 rank count),
    # f32 logits on the inference (label=None) path.
    logits_dtype = jnp.bfloat16 if compute_stats else jnp.float32

    kernel = functools.partial(
        _fused_kernel, n_classes=n_classes, n_rows=n_rows, tm=tm, tn=tn,
        mask_cols=(n_classes < C_pad), compute_stats=compute_stats)

    in_specs = [
        pl.BlockSpec((tm, tk), lambda i, j, k: (i, k)),     # x
        pl.BlockSpec((tk, tn), lambda i, j, k: (k, j)),     # Wt
        pl.BlockSpec((1, tn), lambda i, j, k: (0, j)),      # bias
    ]
    inputs = [x_bf16, wt_bf16, bias_row]
    out_shape = [jax.ShapeDtypeStruct((B_pad, C_pad), logits_dtype)]
    out_specs = [pl.BlockSpec((tm, tn), lambda i, j, k: (i, j))]
    scratch = [pltpu.VMEM((tm, tn), jnp.float32)]           # matmul accumulator

    if compute_stats:
        in_specs.append(pl.BlockSpec((tm, 1), lambda i, j, k: (i, 0)))   # labels
        inputs.append(labels)
        out_shape.append(jax.ShapeDtypeStruct((grid[0] * 8, 128), jnp.float32))
        out_specs.append(pl.BlockSpec((8, 128), lambda i, j, k: (i, 0)))
        scratch += [
            pltpu.VMEM((tm, 1), jnp.float32),   # running max m
            pltpu.VMEM((tm, 1), jnp.float32),   # running sum l
            pltpu.VMEM((tm, 1), jnp.float32),   # target logit
            pltpu.VMEM((tm, 1), jnp.float32),   # best value
            pltpu.VMEM((tm, 1), jnp.int32),     # best index
        ]
        out_shape_arg = tuple(out_shape)
        out_specs_arg = tuple(out_specs)
    else:
        out_shape_arg = out_shape[0]
        out_specs_arg = out_specs[0]

    # VMEM budget derived from the actual tile footprint; stay under the 64 MiB
    # physical VMEM of v7x while using headroom on v5e/v6e.
    est = _vmem_bytes(tm, tn, tk, jnp.dtype(logits_dtype).itemsize, compute_stats)
    vmem_limit = min(max(est + (8 << 20), 16 << 20), 48 << 20)

    return pl.pallas_call(
        kernel,
        out_shape=out_shape_arg,
        grid_spec=pltpu.PrefetchScalarGridSpec(
            num_scalar_prefetch=0,
            grid=grid,
            in_specs=in_specs,
            out_specs=out_specs_arg,
            scratch_shapes=scratch,
        ),
        compiler_params=pltpu.CompilerParams(
            dimension_semantics=("parallel", "arbitrary", "arbitrary"),
            vmem_limit_bytes=int(vmem_limit),
        ),
    )(*inputs)


# ---------------------------------------------------------------------------
# SoftmaxLoss module equivalent
# ---------------------------------------------------------------------------
class SoftmaxLoss:
    def __init__(self, in_feats, n_classes=10, key=None):
        if key is None:
            key = jax.random.PRNGKey(0)
        kw, kb = jax.random.split(key)
        bound = 1.0 / math.sqrt(in_feats)              # nn.Linear default init
        self.in_feats = in_feats
        self.n_classes = n_classes
        self.weight = jax.random.uniform(
            kw, (n_classes, in_feats), jnp.float32, -bound, bound)
        self.bias = jax.random.uniform(
            kb, (n_classes,), jnp.float32, -bound, bound)

        # Kernel-friendly parameter layout built ONCE (no per-call W.T):
        # transposed, padded to 128 multiples, cast to bf16 MXU operands.
        self.F_pad = _round_up(in_feats, 128)
        self.C_pad = _round_up(n_classes, 128)
        wt = jnp.zeros((self.F_pad, self.C_pad), jnp.float32)
        wt = wt.at[:in_feats, :n_classes].set(self.weight.T)
        self.wt_bf16 = wt.astype(jnp.bfloat16)
        self.bias_row = jnp.zeros((1, self.C_pad), jnp.float32
                                  ).at[:, :n_classes].set(self.bias)

    def __call__(self, x, label=None):
        B, F = x.shape
        B_pad = _round_up(B, 128)      # MXU-height batch tiles (tm >= 128)

        # TODO(synk): for very large B the zero-pad copy of x could be avoided
        # with a cdiv grid + the existing row mask; kept explicit here for safety.
        if B_pad == B and self.F_pad == F:
            xp = x.astype(jnp.bfloat16)
        else:
            xp = jnp.zeros((B_pad, self.F_pad), jnp.bfloat16
                           ).at[:B, :F].set(x.astype(jnp.bfloat16))

        if label is None:
            # inference path: CE epilogue / labels / stats compiled out
            logits_pad = fused_linear_softmax(
                xp, self.wt_bf16, self.bias_row, None,
                n_classes=self.n_classes, n_rows=B, compute_stats=False)
            return logits_pad[:B, :self.n_classes]

        lab = jnp.zeros((B_pad, 1), jnp.int32).at[:B, 0].set(
            label.astype(jnp.int32))

        logits_pad, stats = fused_linear_softmax(
            xp, self.wt_bf16, self.bias_row, lab,
            n_classes=self.n_classes, n_rows=B, compute_stats=True)

        nb = stats.shape[0] // 8
        st = stats.reshape(nb, 8, 128)
        loss = jnp.sum(st[:, 0, 0]) / B                 # fused CE (mean)
        prec1 = jnp.sum(st[:, 0, 1]) * (100.0 / B)      # fused top-1

        # top-5 as a rank count over the bf16 logits:
        #   target in top-k  <=>  #{c : logit_c > logit_target} < k
        # (one compare + reduce; replaces the cross-lane lax.top_k sort)
        logits = logits_pad[:B, :self.n_classes]
        tlogit = jnp.take_along_axis(
            logits, label.reshape(-1, 1).astype(jnp.int32), axis=1)
        rank = jnp.sum((logits > tlogit).astype(jnp.int32), axis=1)
        maxk = min(5, self.n_classes)
        prec5 = jnp.sum((rank < maxk).astype(jnp.float32)) * (100.0 / B)
        return loss, prec1, prec5


# ---------------------------------------------------------------------------
if __name__ == "__main__":
    key = jax.random.PRNGKey(0)
    k_x, k_lbl, k_params = jax.random.split(key, 3)

    B, in_feats, n_classes = 8, 32, 10
    x = jax.random.normal(k_x, (B, in_feats), dtype=jnp.float32)
    label = jax.random.randint(k_lbl, (B,), 0, n_classes, dtype=jnp.int32)

    model = SoftmaxLoss(in_feats, n_classes, key=k_params)

    # label=None path: just logits
    logits = model(x)
    jax.block_until_ready(logits)

    # label path: (loss, prec1, prec5)
    loss, prec1, prec5 = model(x, label)
    jax.block_until_ready((loss, prec1, prec5))

    # reference using the same bf16 operands / f32 accumulation
    ref_logits = jnp.dot(x.astype(jnp.bfloat16),
                         model.weight.T.astype(jnp.bfloat16),
                         preferred_element_type=jnp.float32) + model.bias
    ref_lse = jax.scipy.special.logsumexp(ref_logits, axis=-1)
    ref_loss = jnp.mean(ref_lse - ref_logits[jnp.arange(B), label])
    ref_prec1 = jnp.sum((jnp.argmax(ref_logits, axis=-1) == label)
                        .astype(jnp.float32)) * (100.0 / B)
    # top-5 reference via the same rank-count formulation on bf16 logits
    ref_lb = ref_logits.astype(jnp.bfloat16)
    ref_t = jnp.take_along_axis(ref_lb, label[:, None], axis=1)
    ref_rank = jnp.sum((ref_lb > ref_t).astype(jnp.int32), axis=1)
    ref_prec5 = jnp.sum((ref_rank < 5).astype(jnp.float32)) * (100.0 / B)

    assert jnp.allclose(logits, ref_logits, atol=1e-3, rtol=1e-3), "logits mismatch"
    assert jnp.allclose(loss, ref_loss, atol=1e-3, rtol=1e-3), "loss mismatch"
    assert jnp.allclose(prec1, ref_prec1, atol=1e-3), "prec1 mismatch"
    assert jnp.allclose(prec5, ref_prec5, atol=1e-3), "prec5 mismatch"

    print("KERNEL_OK")
</pallas_src>

<mosaic_0001>
module attributes {stable_mosaic.version = 11 : i64} {
  func.func @_fused_kernel(%arg0: i32, %arg1: i32, %arg2: i32, %arg3: memref<128x128xbf16, #tpu.memory_space<vmem>>, %arg4: memref<128x128xbf16, #tpu.memory_space<vmem>>, %arg5: memref<1x128xf32, #tpu.memory_space<vmem>>, %arg6: memref<128x128xf32, #tpu.memory_space<vmem>>, %arg7: memref<128x128xf32, #tpu.memory_space<vmem>>) attributes {dimension_semantics = [#tpu.dimension_semantics<parallel>, #tpu.dimension_semantics<arbitrary>, #tpu.dimension_semantics<arbitrary>], iteration_bounds = array<i64: 1, 1, 1>, scalar_prefetch = 0 : i64, scratch_operands = 1 : i64, tpu.core_type = #tpu.core_type<tc>, window_params = [{transform_indices = @transform_0, window_bounds = array<i64: 128, 128>}, {transform_indices = @transform_1, window_bounds = array<i64: 128, 128>}, {transform_indices = @transform_2, window_bounds = array<i64: 1, 128>}, {transform_indices = @transform_3, window_bounds = array<i64: 128, 128>}]} {
    %c0_i32 = arith.constant 0 : i32
    %0 = arith.cmpi eq, %arg2, %c0_i32 : i32
    %1 = arith.extui %0 : i1 to i32
    %c0_i32_0 = arith.constant 0 : i32
    %2 = arith.cmpi ne, %1, %c0_i32_0 : i32
    scf.if %2 {
      %c0_10 = arith.constant 0 : index
      %c0_11 = arith.constant 0 : index
      %12 = vector.load %arg5[%c0_10, %c0_11] : memref<1x128xf32, #tpu.memory_space<vmem>>, vector<1x128xf32>
      %13 = vector.shape_cast %12 : vector<1x128xf32> to vector<1x128xf32>
      %14 = vector.broadcast %13 : vector<1x128xf32> to vector<128x128xf32>
      %c0_12 = arith.constant 0 : index
      %c0_13 = arith.constant 0 : index
      %15 = vector.load %arg7[%c0_12, %c0_13] : memref<128x128xf32, #tpu.memory_space<vmem>>, vector<128x128xf32>
      tpu.vector_store %arg7[%c0_12, %c0_13], %14 {strides = array<i32>} : memref<128x128xf32, #tpu.memory_space<vmem>>, vector<128x128xf32>,
    } else {
    }
    %c0 = arith.constant 0 : index
    %c0_1 = arith.constant 0 : index
    %3 = vector.load %arg7[%c0, %c0_1] : memref<128x128xf32, #tpu.memory_space<vmem>>, vector<128x128xf32>
    %c0_2 = arith.constant 0 : index
    %c0_3 = arith.constant 0 : index
    %4 = vector.load %arg3[%c0_2, %c0_3] : memref<128x128xbf16, #tpu.memory_space<vmem>>, vector<128x128xbf16>
    %c0_4 = arith.constant 0 : index
    %c0_5 = arith.constant 0 : index
    %5 = vector.load %arg4[%c0_4, %c0_5] : memref<128x128xbf16, #tpu.memory_space<vmem>>, vector<128x128xbf16>
    %cst = arith.constant dense<0.000000e+00> : vector<128x128xf32>
    %6 = tpu.matmul %4, %5, %cst {dimension_numbers = #tpu.dot_dimension_numbers<[1], [0], [0], [1], [0, 0, 1, 1], [], []>} : vector<128x128xbf16>, vector<128x128xbf16>, vector<128x128xf32> -> vector<128x128xf32>
    %7 = arith.addf %3, %6 : vector<128x128xf32>
    %c0_6 = arith.constant 0 : index
    %c0_7 = arith.constant 0 : index
    %8 = vector.load %arg7[%c0_6, %c0_7] : memref<128x128xf32, #tpu.memory_space<vmem>>, vector<128x128xf32>
    tpu.vector_store %arg7[%c0_6, %c0_7], %7 {strides = array<i32>} : memref<128x128xf32, #tpu.memory_space<vmem>>, vector<128x128xf32>,
    %c0_i32_8 = arith.constant 0 : i32
    %9 = arith.cmpi eq, %arg2, %c0_i32_8 : i32
    %10 = arith.extui %9 : i1 to i32
    %c0_i32_9 = arith.constant 0 : i32
    %11 = arith.cmpi ne, %10, %c0_i32_9 : i32
    scf.if %11 {
      %c0_10 = arith.constant 0 : index
      %c0_11 = arith.constant 0 : index
      %12 = vector.load %arg7[%c0_10, %c0_11] : memref<128x128xf32, #tpu.memory_space<vmem>>, vector<128x128xf32>
      %c0_12 = arith.constant 0 : index
      %c0_13 = arith.constant 0 : index
      %13 = vector.load %arg6[%c0_12, %c0_13] : memref<128x128xf32, #tpu.memory_space<vmem>>, vector<128x128xf32>
      tpu.vector_store %arg6[%c0_12, %c0_13], %12 {strides = array<i32>} : memref<128x128xf32, #tpu.memory_space<vmem>>, vector<128x128xf32>,
    } else {
    }
    return
  }
  func.func @transform_0(%arg0: i32, %arg1: i32, %arg2: i32) -> (i32, i32) {
    %c0_i32 = arith.constant 0 : i32
    return %arg0, %arg2 : i32, i32
  }
  func.func @transform_1(%arg0: i32, %arg1: i32, %arg2: i32) -> (i32, i32) {
    %c0_i32 = arith.constant 0 : i32
    return %arg2, %arg1 : i32, i32
  }
  func.func @transform_2(%arg0: i32, %arg1: i32, %arg2: i32) -> (i32, i32) {
    %c0_i32 = arith.constant 0 : i32
    %c0_i32_0 = arith.constant 0 : i32
    return %c0_i32, %arg1 : i32, i32
  }
  func.func @transform_3(%arg0: i32, %arg1: i32, %arg2: i32) -> (i32, i32) {
    %c0_i32 = arith.constant 0 : i32
    return %arg0, %arg1 : i32, i32
  }
}

</mosaic_0001>

<bundles_post_ra>
// kernel: tpu_custom_call.1
= control target key start
LH: loop header
LB: loop body
LE: loop exit
PB: predicated region body
PF: predicated region fallthrough
CT: control target
= control target key end

     0   :  { %8 = vsyncpa [#allocation4], 0  ;;  %s639_s0 = inlined_call_operand.hbm [shape: bf16[128,128], index: 0, kind: input, shape index: {}]   ;;  %s640_s1 = inlined_call_operand.hbm [shape: bf16[128,128], index: 1, kind: input, shape index: {}]   ;;  %s641_s2 = inlined_call_operand.vmem [shape: f32[1,128], index: 2, kind: input, shape index: {}]   ;;  %s642_s3 = inlined_call_operand.hbm [shape: f32[128,128], index: 3, kind: output, shape index: {}]  }
   0x1   :  { %9 = vsyncpa [#allocation7], 0 }
   0x2   :  { %10 = vsyncpa [#allocation5], 0  ;;  %s573_s12 = smov [#allocation3]   ;;  %s501_s16 = scalar_lea.hbm %s639_s0, 1024 }
   0x3   :  { %s16_s13 = sshll.u32 %s573_s12, 4  ;;  %p502_p0 = scmp.ne.s32.totalorder %s639_s0, %s501_s16  ;;  %s17_s13 = int_to_ptr.vmem [resolvable:$true] %s16_s13 }
   0x4   :  { %p505_p1 = scmp.lt.u32.totalorder %s501_s16, %s639_s0 }
   0x6   :  { %p507_p2 = pnand %p505_p1, %p502_p0 }
   0x8   :  { %510 = shalt.err (!%p507_p2)
}
   0x9   :  { %s511_s21 = scalar_lea.vmem %s17_s13, 1024  ;;  %p516_p4 = scmp.lt.s32.totalorder %s17_s13, %s17_s13 }
   0xa   :  { %p512_p3 = scmp.ne.s32.totalorder %s17_s13, %s511_s21  ;;  %p517_p5 = scmp.lt.s32.totalorder %s511_s21, %s511_s21 }
   0xc   :  { %p518_p6 = por %p517_p5, %p516_p4 }
   0xe   :  { %p519_p7 = pnand %p518_p6, %p512_p3 }
  0x10   :  { %522 = shalt.err (!%p519_p7)
}
  0x11   :  { %s574_s22 = smov 64   ;;  %s575_s23 = smov 4  }
  0x12   :  { %22 = dma.hbm_to_vmem [thread:$0]  %s639_s0, 1024, %s17_s13, [#allocation4], %s574_s22, %s574_s22, %s575_s23  }
  0x13   :  { %s576_s26 = smov [#allocation6]   ;;  %s523_s30 = scalar_lea.hbm %s640_s1, 1024 }
  0x14   :  { %s28_s27 = sshll.u32 %s576_s26, 4  ;;  %p524_p8 = scmp.ne.s32.totalorder %s640_s1, %s523_s30  ;;  %s29_s27 = int_to_ptr.vmem [resolvable:$true] %s28_s27 }
  0x15   :  { %p527_p9 = scmp.lt.u32.totalorder %s523_s30, %s640_s1 }
  0x17   :  { %p529_p10 = pnand %p527_p9, %p524_p8 }
  0x19   :  { %532 = shalt.err (!%p529_p10)
}
  0x1a   :  { %s533_s8 = scalar_lea.vmem %s29_s27, 1024  ;;  %p538_p12 = scmp.lt.s32.totalorder %s29_s27, %s29_s27 }
  0x1b   :  { %p534_p11 = scmp.ne.s32.totalorder %s29_s27, %s533_s8  ;;  %p539_p13 = scmp.lt.s32.totalorder %s533_s8, %s533_s8 }
  0x1d   :  { %p540_p0 = por %p539_p13, %p538_p12 }
  0x1f   :  { %p541_p1 = pnand %p540_p0, %p534_p11 }
  0x21   :  { %544 = shalt.err (!%p541_p1)
}
  0x22   :  { %34 = dma.hbm_to_vmem [thread:$0]  %s640_s1, 1024, %s29_s27, [#allocation7], %s574_s22, %s574_s22, %s575_s23  }
  0x23   :  { %567 = dma.done.wait [#allocation4], 1024  }
  0x24   :  { %568 = vsyncadd [#allocation4], 4294966272 }
  0x25   :  { %569 = dma.done.wait [#allocation7], 1024  }
  0x26   :  { %570 = vsyncadd [#allocation7], 4294966272  ;;  %v485_v0 = vld [vmem:[#allocation6] sm:$0xff]   ;;  %v486_v1 = vld [vmem:[#allocation6 + $0x8] sm:$0xff]  }
  0x27   :  { %430 = vmatprep.subr.bf16.mxu0 %v485_v0  ;;  %462 = vmatprep.subr.bf16.mxu1 %v485_v0  ;;  %v487_v2 = vld [vmem:[#allocation6 + $0x10] sm:$0xff]   ;;  %v488_v3 = vld [vmem:[#allocation6 + $0x18] sm:$0xff]   ;;  %v493_v4 = vld [vmem:[#allocation3] sm:$0xff]  }
  0x28   :  { %431 = vmatpush3.bf16.msra.mxu0 %v485_v0  ;;  %470 = vmatpush3.bf16.msra.mxu1 %v485_v0  ;;  %v494_v5 = vld [vmem:[#allocation3 + $0x20] sm:$0xff]   ;;  %v490_v7 = vld [vmem:[#allocation6 + $0x28] sm:$0xff]   ;;  %v491_v8 = vld [vmem:[#allocation6 + $0x30] sm:$0xff]  }
  0x29   :  { %432 = vmatprep.subr.bf16.mxu0 %v486_v1  ;;  %463 = vmatprep.subr.bf16.mxu1 %v486_v1  ;;  %v489_v6 = vld [vmem:[#allocation6 + $0x20] sm:$0xff]   ;;  %v492_v9 = vld [vmem:[#allocation6 + $0x38] sm:$0xff]   ;;  %v495_v10 = vld [vmem:[#allocation3 + $0x8] sm:$0xff]  }
  0x2a   :  { %446 = vmatprep.mubr.bf16.mxu0 %v493_v4  ;;  %454 = vmatprep.mubr.bf16.mxu1 %v494_v5  ;;  %v496_v11 = vld [vmem:[#allocation3 + $0x28] sm:$0xff]   ;;  %v497_v12 = vld [vmem:[#allocation3 + $0x10] sm:$0xff]   ;;  %v499_v14 = vld [vmem:[#allocation3 + $0x18] sm:$0xff]  }
  0x2b   :  { %v498_v13 = vld [vmem:[#allocation3 + $0x30] sm:$0xff]   ;;  %v500_v15 = vld [vmem:[#allocation3 + $0x38] sm:$0xff]   ;;  %v397_v16 = vld [vmem:[%s641_s2] ss:$0 sm:$0xff]  ;;  %s577_s2 = smov [#allocation8]  }
  0x2c   :  { %433 = vmatpush3.bf16.msra.mxu0 %v486_v1  ;;  %471 = vmatpush3.bf16.msra.mxu1 %v486_v1  ;;  %s384_s11 = sshll.u32 %s577_s2, 4  ;;  %s385_s11 = int_to_ptr.vmem [resolvable:$true] %s384_s11 }
  0x2d   :  { %434 = vmatprep.subr.bf16.mxu0 %v487_v2  ;;  %464 = vmatprep.subr.bf16.mxu1 %v487_v2  ;;  %s545_s12 = scalar_lea.vmem %s385_s11, 2048  ;;  %p550_p3 = scmp.lt.s32.totalorder %s385_s11, %s385_s11 }
  0x2e   :  { %p546_p2 = scmp.ne.s32.totalorder %s385_s11, %s545_s12  ;;  %p551_p4 = scmp.lt.s32.totalorder %s545_s12, %s545_s12 }
  0x30   :  { %435 = vmatpush3.bf16.msra.mxu0 %v487_v2  ;;  %472 = vmatpush3.bf16.msra.mxu1 %v487_v2  ;;  %p552_p5 = por %p551_p4, %p550_p3 }
  0x31   :  { %436 = vmatprep.subr.bf16.mxu0 %v488_v3  ;;  %465 = vmatprep.subr.bf16.mxu1 %v488_v3 }
  0x32   :  { %p553_p6 = pnand %p552_p5, %p546_p2 }
  0x34   :  { %437 = vmatpush3.bf16.msra.mxu0 %v488_v3  ;;  %473 = vmatpush3.bf16.msra.mxu1 %v488_v3 }
  0x35   :  { %438 = vmatprep.subr.bf16.mxu0 %v489_v6  ;;  %466 = vmatprep.subr.bf16.mxu1 %v489_v6 }
  0x38   :  { %439 = vmatpush3.bf16.msra.mxu0 %v489_v6  ;;  %474 = vmatpush3.bf16.msra.mxu1 %v489_v6 }
  0x39   :  { %440 = vmatprep.subr.bf16.mxu0 %v490_v7  ;;  %467 = vmatprep.subr.bf16.mxu1 %v490_v7 }
  0x3c   :  { %441 = vmatpush3.bf16.msra.mxu0 %v490_v7  ;;  %475 = vmatpush3.bf16.msra.mxu1 %v490_v7 }
  0x3d   :  { %442 = vmatprep.subr.bf16.mxu0 %v491_v8  ;;  %468 = vmatprep.subr.bf16.mxu1 %v491_v8 }
  0x40   :  { %443 = vmatpush3.bf16.msra.mxu0 %v491_v8  ;;  %476 = vmatpush3.bf16.msra.mxu1 %v491_v8 }
  0x41   :  { %444 = vmatprep.subr.bf16.mxu0 %v492_v9  ;;  %469 = vmatprep.subr.bf16.mxu1 %v492_v9 }
  0x44   :  { %445 = vmatpush3.bf16.msra.mxu0 %v492_v9  ;;  %477 = vmatpush3.bf16.msra.mxu1 %v492_v9 }
  0x47   :  { %447 = vmatmul.mubr.bf16.vlgmr.msra.gmra.mrb[0].mxu0 %v495_v10  ;;  %455 = vmatmul.mubr.bf16.vlgmr.msra.gmra.mrb[0].mxu1 %v496_v11 }
  0x48   :  { %450 = vmatprep.mubr.bf16.mxu0 %v497_v12  ;;  %458 = vmatprep.mubr.bf16.mxu1 %v498_v13 }
  0x4f   :  { %451 = vmatmul.mubr.bf16.gmra.mrb[4].mxu0 %v499_v14  ;;  %459 = vmatmul.mubr.bf16.gmra.mrb[4].mxu1 %v500_v15 }
 0x11a   :  { %v448_v17 = vpop.f32.mrb[0].mxu0  ;;  %v456_v18 = vpop.f32.mrb[0].mxu1 }
 0x11b   :  { %v314_v19 = vadd.f32 %v448_v17, %v397_v16  ;;  %v322_v20 = vadd.f32 %v456_v18, %v397_v16  ;;  %v249_v21 = vpop.f32.mrb[1].mxu0  ;;  %v281_v22 = vpop.f32.mrb[1].mxu1 }
 0x11c   :  { %v312_v23 = vadd.f32 %v397_v16, %v249_v21  ;;  %v320_v24 = vadd.f32 %v397_v16, %v281_v22  ;;  %v449_v25 = vpop.f32.mrb[2].mxu0  ;;  %v457_v26 = vpop.f32.mrb[2].mxu1 }
 0x11d   :  { %365 = vst [vmem:[#allocation8 + $0x10] sm:$0xff] %v314_v19  ;;  %373 = vst [vmem:[#allocation8 + $0x50] sm:$0xff] %v322_v20  ;;  %v315_v27 = vadd.f32 %v449_v25, %v397_v16  ;;  %v323_v28 = vadd.f32 %v457_v26, %v397_v16  ;;  %v252_v29 = vpop.f32.mrb[3].mxu0  ;;  %v284_v30 = vpop.f32.mrb[3].mxu1 }
 0x11e   :  { %363 = vst [vmem:[#allocation8] sm:$0xff] %v312_v23  ;;  %371 = vst [vmem:[#allocation8 + $0x40] sm:$0xff] %v320_v24  ;;  %v313_v31 = vadd.f32 %v397_v16, %v252_v29  ;;  %v321_v32 = vadd.f32 %v397_v16, %v284_v30 }
 0x11f   :  { %366 = vst [vmem:[#allocation8 + $0x18] sm:$0xff] %v315_v27  ;;  %374 = vst [vmem:[#allocation8 + $0x58] sm:$0xff] %v323_v28 }
 0x120   :  { %364 = vst [vmem:[#allocation8 + $0x8] sm:$0xff] %v313_v31  ;;  %372 = vst [vmem:[#allocation8 + $0x48] sm:$0xff] %v321_v32 }
 0x122   :  { %v452_v33 = vpop.f32.mrb[4].mxu0  ;;  %v460_v34 = vpop.f32.mrb[4].mxu1 }
 0x123   :  { %v318_v35 = vadd.f32 %v452_v33, %v397_v16  ;;  %v326_v36 = vadd.f32 %v460_v34, %v397_v16  ;;  %v265_v37 = vpop.f32.mrb[5].mxu0  ;;  %v297_v38 = vpop.f32.mrb[5].mxu1 }
 0x124   :  { %v316_v39 = vadd.f32 %v397_v16, %v265_v37  ;;  %v324_v40 = vadd.f32 %v397_v16, %v297_v38  ;;  %v453_v41 = vpop.f32.mrb[6].mxu0  ;;  %v461_v42 = vpop.f32.mrb[6].mxu1 }
 0x125   :  { %369 = vst [vmem:[#allocation8 + $0x30] sm:$0xff] %v318_v35  ;;  %377 = vst [vmem:[#allocation8 + $0x70] sm:$0xff] %v326_v36  ;;  %v319_v43 = vadd.f32 %v453_v41, %v397_v16  ;;  %v327_v44 = vadd.f32 %v461_v42, %v397_v16  ;;  %v268_v45 = vpop.f32.mrb[7].mxu0  ;;  %v300_v46 = vpop.f32.mrb[7].mxu1 }
 0x126   :  { %367 = vst [vmem:[#allocation8 + $0x20] sm:$0xff] %v316_v39  ;;  %375 = vst [vmem:[#allocation8 + $0x60] sm:$0xff] %v324_v40  ;;  %v317_v47 = vadd.f32 %v397_v16, %v268_v45  ;;  %v325_v48 = vadd.f32 %v397_v16, %v300_v46 }
 0x127   :  { %370 = vst [vmem:[#allocation8 + $0x38] sm:$0xff] %v319_v43  ;;  %378 = vst [vmem:[#allocation8 + $0x78] sm:$0xff] %v327_v44 }
 0x128   :  { %368 = vst [vmem:[#allocation8 + $0x28] sm:$0xff] %v317_v47  ;;  %376 = vst [vmem:[#allocation8 + $0x68] sm:$0xff] %v325_v48 }
 0x129   :  { %556 = shalt.err (!%p553_p6)
}
 0x12a   :  { %s557_s15 = scalar_lea.hbm %s642_s3, 2048 }
 0x12b   :  { %p558_p7 = scmp.ne.s32.totalorder %s642_s3, %s557_s15  ;;  %p561_p8 = scmp.lt.u32.totalorder %s557_s15, %s642_s3 }
 0x12d   :  { %p563_p9 = pnand %p561_p8, %p558_p7 }
 0x12f   :  { %566 = shalt.err (!%p563_p9)
}
 0x130   :  { %s578_s20 = smov 128   ;;  %s579_s21 = smov 8  }
 0x131   :  { %390 = dma.vmem_to_hbm [thread:$0]  %s385_s11, 2048, %s642_s3, [#allocation5], %s578_s20, %s578_s20, %s579_s21  }
 0x132   :  { %571 = dma.done.wait [#allocation5], 2048  }
 0x133   :  { %572 = vsyncadd [#allocation5], 4294965248 }
 0x134   :  { %394 = vsyncpa [#allocation4], 1 }
 0x135   :  { %395 = vsyncpa [#allocation7], 1 }
 0x136   :  { %396 = vsyncpa [#allocation5], 1 }

</bundles_post_ra>
